<compile_context>
chip_gen: v6e
topology: v6e:2x2x1
jax: 0.10.0
libtpu: 0.0.40
codegen_flags: <defaults>
</compile_context>

<pallas_src>
import functools
import math

import jax
import jax.numpy as jnp
from jax.experimental import pallas as pl
from jax.experimental.pallas import tpu as pltpu


def _round_up(x, m):
    return ((x + m - 1) // m) * m


def _eq_linear_kernel(x_ref, w_ref, b_ref, o_ref, acc_ref, *, scale):
    """One (TM, TN) output tile; grid axis 2 (K) is the reduction axis."""
    k = pl.program_id(2)

    @pl.when(k == 0)
    def _():
        # Fold the (unscaled) bias into the accumulator init: saves the
        # epilogue add, and the final scale then applies to (xW^T + b).
        acc_ref[...] = jnp.broadcast_to(b_ref[...], acc_ref.shape)

    # W is pre-transposed (c_in, c_out) and bf16; plain last-dim-contraction
    # MXU matmul with f32 accumulation — no in-kernel transpose.
    acc_ref[...] += jnp.dot(x_ref[...], w_ref[...],
                            preferred_element_type=jnp.float32)

    @pl.when(k == pl.num_programs(2) - 1)
    def _():
        # Equalized-LR scale multiplies the whole linear output (bias incl.).
        o_ref[...] = (acc_ref[...] * scale).astype(o_ref.dtype)


class EqualizedLinearPallas:
    """EqualizedLinear forward with cached (one-time) weight preparation.

    out = (x @ weight.T + bias) * sqrt(2 / c_in)
    """

    def __init__(self, weight, bias, *, compute_dtype=jnp.bfloat16,
                 tm_max=512, tn_max=512, tk_max=1024, batch_hint=None):
        c_out, c_in = weight.shape
        assert bias.shape == (c_out,)
        self.c_in, self.c_out = c_in, c_out
        self.scale = math.sqrt(2.0 / c_in)
        self.compute_dtype = compute_dtype
        self.tm_max = tm_max

        # ---- N/K tile selection (depends only on layer widths) ------------
        tk = min(_round_up(c_in, 128), tk_max)
        tn = min(_round_up(c_out, 128), tn_max)

        # v7x megacore: if the batch is small enough that M has a single
        # block, make sure the N axis has >= 2 blocks (only when it costs no
        # extra padding) so both TensorCores get work.
        np0 = _round_up(c_out, 128)
        small_batch = batch_hint is None or _round_up(batch_hint, 8) <= tm_max
        if small_batch and np0 >= 256 and (np0 // 2) % 128 == 0:
            tn = min(tn, np0 // 2)

        self.tn, self.tk = tn, tk
        self.Kp = _round_up(c_in, tk)
        self.Np = _round_up(c_out, tn)

        # ---- one-time parameter transform (cached across calls) -----------
        # Transpose so the kernel contracts the last dim of x with the first
        # dim of W, zero-pad to the tile grid, cast to the MXU-native dtype.
        w_t = jnp.asarray(weight).T.astype(compute_dtype)        # (c_in, c_out)
        self.w_t = jnp.pad(w_t, ((0, self.Kp - c_in), (0, self.Np - c_out)))
        b = jnp.asarray(bias).astype(jnp.float32).reshape(1, c_out)
        self.b = jnp.pad(b, ((0, 0), (0, self.Np - c_out)))

    def __call__(self, x):
        B, c_in = x.shape
        assert c_in == self.c_in
        out_dtype = x.dtype

        tn, tk, Np, Kp = self.tn, self.tk, self.Np, self.Kp
        tm = min(_round_up(B, 8), self.tm_max)
        Mp = _round_up(B, tm)

        xp = x.astype(self.compute_dtype)
        if Mp != B or Kp != c_in:
            xp = jnp.pad(xp, ((0, Mp - B), (0, Kp - c_in)))

        grid = (Mp // tm, Np // tn, Kp // tk)

        in_bytes = jnp.dtype(self.compute_dtype).itemsize
        out_bytes = jnp.dtype(out_dtype).itemsize
        # Double-buffered operand/output/bias tiles + f32 accumulator scratch.
        vmem_bytes = (2 * (tm * tk + tk * tn) * in_bytes
                      + 2 * tn * 4
                      + 2 * tm * tn * out_bytes
                      + tm * tn * 4)
        # Generous headroom, but capped below v7x's 64 MiB physical VMEM.
        vmem_limit = min(max(vmem_bytes + (4 << 20), 16 << 20), 48 << 20)

        cost = pl.CostEstimate(
            flops=2 * Mp * Kp * Np,
            transcendentals=0,
            bytes_accessed=(Mp * Kp * in_bytes * (Np // tn)    # x re-streams
                            + Kp * Np * in_bytes * (Mp // tm)  # W re-streams
                            + Mp * Np * out_bytes + Np * 4),
        )

        kernel = functools.partial(_eq_linear_kernel, scale=self.scale)

        out_padded = pl.pallas_call(
            kernel,
            out_shape=jax.ShapeDtypeStruct((Mp, Np), out_dtype),
            grid_spec=pltpu.PrefetchScalarGridSpec(
                num_scalar_prefetch=0,
                grid=grid,
                in_specs=[
                    pl.BlockSpec((tm, tk), lambda i, j, k: (i, k)),   # x  (bf16)
                    pl.BlockSpec((tk, tn), lambda i, j, k: (k, j)),   # W^T (bf16)
                    pl.BlockSpec((1, tn), lambda i, j, k: (0, j)),    # bias (f32)
                ],
                out_specs=pl.BlockSpec((tm, tn), lambda i, j, k: (i, j)),
                scratch_shapes=[pltpu.VMEM((tm, tn), jnp.float32)],
            ),
            compiler_params=pltpu.CompilerParams(
                dimension_semantics=("parallel", "parallel", "arbitrary"),
                vmem_limit_bytes=vmem_limit,
            ),
            cost_estimate=cost,
        )(xp, self.w_t, self.b)

        return out_padded[:B, :self.c_out]


def equalized_linear(x, weight, bias, **kwargs):
    """One-shot convenience wrapper. For repeated calls, construct
    EqualizedLinearPallas once and reuse it (the weight transform is cached)."""
    layer = EqualizedLinearPallas(weight, bias, batch_hint=x.shape[0], **kwargs)
    return layer(x)


if __name__ == "__main__":
    key = jax.random.PRNGKey(0)
    k_x, k_w, k_b = jax.random.split(key, 3)

    B, c_in, c_out = 8, 32, 16

    x = jax.random.normal(k_x, (B, c_in), dtype=jnp.float32)
    # nn.Linear weight shape is (c_out, c_in); .normal_() init, bias zeroed.
    weight = jax.random.normal(k_w, (c_out, c_in), dtype=jnp.float32)
    bias = jnp.zeros((c_out,), dtype=jnp.float32)

    scale = math.sqrt(2.0 / c_in)

    # Cached-parameter path: prepare once, call twice.
    layer = EqualizedLinearPallas(weight, bias, batch_hint=B)
    out = jax.block_until_ready(layer(x))
    out2 = jax.block_until_ready(layer(x))
    assert out.shape == (B, c_out)
    assert jnp.allclose(out, out2)

    # Reference in the kernel's compute precision (bf16 operands, f32 accum).
    xb = x.astype(jnp.bfloat16).astype(jnp.float32)
    wb = weight.astype(jnp.bfloat16).astype(jnp.float32)
    ref_bf16 = (xb @ wb.T + bias[None, :]) * scale
    assert jnp.allclose(out, ref_bf16, atol=1e-3, rtol=1e-3)

    # Loose check against the exact fp32 reference (module semantics).
    ref_f32 = (x @ weight.T + bias[None, :]) * scale
    assert jnp.allclose(out, ref_f32, atol=1e-1, rtol=5e-2)

    # Nonzero bias: module scales (Wx + b); the kernel scales the whole
    # accumulator (bias folded into the init), which must match.
    bias_nz = jax.random.normal(k_b, (c_out,), dtype=jnp.float32)
    out_nz = jax.block_until_ready(equalized_linear(x, weight, bias_nz))
    ref_nz = (xb @ wb.T + bias_nz[None, :]) * scale
    assert jnp.allclose(out_nz, ref_nz, atol=1e-3, rtol=1e-3)

    print("KERNEL_OK")
</pallas_src>

<mosaic_0001>
module attributes {stable_mosaic.version = 11 : i64} {
  func.func @_eq_linear_kernel(%arg0: i32, %arg1: i32, %arg2: i32, %arg3: memref<8x128xbf16, #tpu.memory_space<vmem>>, %arg4: memref<128x128xbf16, #tpu.memory_space<vmem>>, %arg5: memref<1x128xf32, #tpu.memory_space<vmem>>, %arg6: memref<8x128xf32, #tpu.memory_space<vmem>>, %arg7: memref<8x128xf32, #tpu.memory_space<vmem>>) attributes {dimension_semantics = [#tpu.dimension_semantics<parallel>, #tpu.dimension_semantics<parallel>, #tpu.dimension_semantics<arbitrary>], iteration_bounds = array<i64: 1, 1, 1>, scalar_prefetch = 0 : i64, scratch_operands = 1 : i64, tpu.core_type = #tpu.core_type<tc>, window_params = [{transform_indices = @transform_0, window_bounds = array<i64: 8, 128>}, {transform_indices = @transform_1, window_bounds = array<i64: 128, 128>}, {transform_indices = @transform_2, window_bounds = array<i64: 1, 128>}, {transform_indices = @transform_3, window_bounds = array<i64: 8, 128>}]} {
    %c0_i32 = arith.constant 0 : i32
    %0 = arith.cmpi eq, %arg2, %c0_i32 : i32
    %1 = arith.extui %0 : i1 to i32
    %c0_i32_0 = arith.constant 0 : i32
    %2 = arith.cmpi ne, %1, %c0_i32_0 : i32
    scf.if %2 {
      %c0_10 = arith.constant 0 : index
      %c0_11 = arith.constant 0 : index
      %12 = vector.load %arg5[%c0_10, %c0_11] : memref<1x128xf32, #tpu.memory_space<vmem>>, vector<1x128xf32>
      %13 = vector.shape_cast %12 : vector<1x128xf32> to vector<1x128xf32>
      %14 = vector.broadcast %13 : vector<1x128xf32> to vector<8x128xf32>
      %c0_12 = arith.constant 0 : index
      %c0_13 = arith.constant 0 : index
      %15 = vector.load %arg7[%c0_12, %c0_13] : memref<8x128xf32, #tpu.memory_space<vmem>>, vector<8x128xf32>
      tpu.vector_store %arg7[%c0_12, %c0_13], %14 {strides = array<i32>} : memref<8x128xf32, #tpu.memory_space<vmem>>, vector<8x128xf32>,
    } else {
    }
    %c0 = arith.constant 0 : index
    %c0_1 = arith.constant 0 : index
    %3 = vector.load %arg7[%c0, %c0_1] : memref<8x128xf32, #tpu.memory_space<vmem>>, vector<8x128xf32>
    %c0_2 = arith.constant 0 : index
    %c0_3 = arith.constant 0 : index
    %4 = vector.load %arg3[%c0_2, %c0_3] : memref<8x128xbf16, #tpu.memory_space<vmem>>, vector<8x128xbf16>
    %c0_4 = arith.constant 0 : index
    %c0_5 = arith.constant 0 : index
    %5 = vector.load %arg4[%c0_4, %c0_5] : memref<128x128xbf16, #tpu.memory_space<vmem>>, vector<128x128xbf16>
    %cst = arith.constant dense<0.000000e+00> : vector<8x128xf32>
    %6 = tpu.matmul %4, %5, %cst {dimension_numbers = #tpu.dot_dimension_numbers<[1], [0], [0], [1], [0, 0, 1, 1], [], []>} : vector<8x128xbf16>, vector<128x128xbf16>, vector<8x128xf32> -> vector<8x128xf32>
    %7 = arith.addf %3, %6 : vector<8x128xf32>
    %c0_6 = arith.constant 0 : index
    %c0_7 = arith.constant 0 : index
    %8 = vector.load %arg7[%c0_6, %c0_7] : memref<8x128xf32, #tpu.memory_space<vmem>>, vector<8x128xf32>
    tpu.vector_store %arg7[%c0_6, %c0_7], %7 {strides = array<i32>} : memref<8x128xf32, #tpu.memory_space<vmem>>, vector<8x128xf32>,
    %c0_i32_8 = arith.constant 0 : i32
    %9 = arith.cmpi eq, %arg2, %c0_i32_8 : i32
    %10 = arith.extui %9 : i1 to i32
    %c0_i32_9 = arith.constant 0 : i32
    %11 = arith.cmpi ne, %10, %c0_i32_9 : i32
    scf.if %11 {
      %c0_10 = arith.constant 0 : index
      %c0_11 = arith.constant 0 : index
      %12 = vector.load %arg7[%c0_10, %c0_11] : memref<8x128xf32, #tpu.memory_space<vmem>>, vector<8x128xf32>
      %cst_12 = arith.constant 2.500000e-01 : f32
      %13 = vector.broadcast %cst_12 : f32 to vector<8x128xf32>
      %14 = arith.mulf %12, %13 : vector<8x128xf32>
      %c0_13 = arith.constant 0 : index
      %c0_14 = arith.constant 0 : index
      %15 = vector.load %arg6[%c0_13, %c0_14] : memref<8x128xf32, #tpu.memory_space<vmem>>, vector<8x128xf32>
      tpu.vector_store %arg6[%c0_13, %c0_14], %14 {strides = array<i32>} : memref<8x128xf32, #tpu.memory_space<vmem>>, vector<8x128xf32>,
    } else {
    }
    return
  }
  func.func @transform_0(%arg0: i32, %arg1: i32, %arg2: i32) -> (i32, i32) {
    %c0_i32 = arith.constant 0 : i32
    return %arg0, %arg2 : i32, i32
  }
  func.func @transform_1(%arg0: i32, %arg1: i32, %arg2: i32) -> (i32, i32) {
    %c0_i32 = arith.constant 0 : i32
    return %arg2, %arg1 : i32, i32
  }
  func.func @transform_2(%arg0: i32, %arg1: i32, %arg2: i32) -> (i32, i32) {
    %c0_i32 = arith.constant 0 : i32
    %c0_i32_0 = arith.constant 0 : i32
    return %c0_i32, %arg1 : i32, i32
  }
  func.func @transform_3(%arg0: i32, %arg1: i32, %arg2: i32) -> (i32, i32) {
    %c0_i32 = arith.constant 0 : i32
    return %arg0, %arg1 : i32, i32
  }
}

</mosaic_0001>

<bundles_post_ra>
// kernel: tpu_custom_call.1
= control target key start
LH: loop header
LB: loop body
LE: loop exit
PB: predicated region body
PF: predicated region fallthrough
CT: control target
= control target key end

     0   :  { %8 = vsyncpa [#allocation4], 0  ;;  %s342_s0 = inlined_call_operand.hbm [shape: bf16[8,128], index: 0, kind: input, shape index: {}]   ;;  %s343_s1 = inlined_call_operand.hbm [shape: bf16[128,128], index: 1, kind: input, shape index: {}]   ;;  %s344_s2 = inlined_call_operand.vmem [shape: f32[1,128], index: 2, kind: input, shape index: {}]   ;;  %s345_s3 = inlined_call_operand.hbm [shape: f32[8,128], index: 3, kind: output, shape index: {}]  }
   0x1   :  { %9 = vsyncpa [#allocation7], 0 }
   0x2   :  { %10 = vsyncpa [#allocation5], 0  ;;  %s303_s12 = smov [#allocation3]   ;;  %s304_s14 = smov [#allocation6]  }
   0x3   :  { %s17_s13 = sshll.u32 %s303_s12, 4  ;;  %s26_s15 = sshll.u32 %s304_s14, 4  ;;  %s18_s13 = int_to_ptr.vmem [resolvable:$true] %s17_s13  ;;  %s27_s15 = int_to_ptr.vmem [resolvable:$true] %s26_s15 }
   0x4   :  { %s245_s16 = scalar_lea.vmem %s18_s13, 64  ;;  %p250_p1 = scmp.lt.s32.totalorder %s18_s13, %s18_s13 }
   0x5   :  { %p246_p0 = scmp.ne.s32.totalorder %s18_s13, %s245_s16  ;;  %p251_p2 = scmp.lt.s32.totalorder %s245_s16, %s245_s16 }
   0x7   :  { %p252_p3 = por %p251_p2, %p250_p1 }
   0x9   :  { %p253_p4 = pnand %p252_p3, %p246_p0 }
   0xb   :  { %256 = shalt.err (!%p253_p4)
}
   0xc   :  { %20 = dma.hbm_to_vmem [thread:$0]  %s342_s0, 64, %s18_s13, [#allocation4]  }
   0xd   :  { %s265_s19 = scalar_lea.vmem %s27_s15, 1024  ;;  %p270_p6 = scmp.lt.s32.totalorder %s27_s15, %s27_s15 }
   0xe   :  { %p266_p5 = scmp.ne.s32.totalorder %s27_s15, %s265_s19  ;;  %p271_p7 = scmp.lt.s32.totalorder %s265_s19, %s265_s19 }
  0x10   :  { %p272_p8 = por %p271_p7, %p270_p6 }
  0x12   :  { %p273_p9 = pnand %p272_p8, %p266_p5 }
  0x14   :  { %276 = shalt.err (!%p273_p9)
}
  0x15   :  { %s305_s20 = smov 64   ;;  %s306_s21 = smov 4  }
  0x16   :  { %32 = dma.hbm_to_vmem [thread:$0]  %s343_s1, 1024, %s27_s15, [#allocation7], %s305_s20, %s305_s20, %s306_s21  }
  0x17   :  { %297 = dma.done.wait [#allocation4], 64  }
  0x18   :  { %298 = vsyncadd [#allocation4], 4294967232 }
  0x19   :  { %299 = dma.done.wait [#allocation7], 1024  }
  0x1a   :  { %300 = vsyncadd [#allocation7], 4294966272  ;;  %v307_v0 = vmov 0.0   ;;  %vm308_vm0 = vmmov 0   ;;  %v229_v1 = vld [vmem:[#allocation6 + $0x38] sm:$0xff]   ;;  %v230_v2 = vld [vmem:[#allocation6 + $0x30] sm:$0xff]  }
  0x1b   :  { %202 = vmatprep.subr.bf16.mxu0 %v307_v0  ;;  %218 = vmatprep.mubr.msk.bf16.mxu0 %vm308_vm0, %v307_v0  ;;  %v231_v3 = vld [vmem:[#allocation6 + $0x28] sm:$0xff]   ;;  %v232_v4 = vld [vmem:[#allocation6 + $0x20] sm:$0xff]   ;;  %v233_v5 = vld [vmem:[#allocation6 + $0x18] sm:$0xff]   ;;  %s309_s24 = smov [#allocation8]  }
  0x1c   :  { %203 = vmatpush3.bf16.msra.mxu0 %v229_v1  ;;  %v234_v6 = vld [vmem:[#allocation6 + $0x10] sm:$0xff]   ;;  %v235_v7 = vld [vmem:[#allocation6 + $0x8] sm:$0xff]   ;;  %v236_v8 = vld [vmem:[#allocation6] sm:$0xff]   ;;  %s174_s25 = sshll.u32 %s309_s24, 4  ;;  %s175_s25 = int_to_ptr.vmem [resolvable:$true] %s174_s25 }
  0x1d   :  { %204 = vmatprep.subr.bf16.mxu0 %v307_v0  ;;  %v55_v9 = vld [vmem:[#allocation3] sm:$0xf]  ;;  %s277_s26 = scalar_lea.vmem %s175_s25, 128  ;;  %p282_p11 = scmp.lt.s32.totalorder %s175_s25, %s175_s25 }
  0x1e   :  { %v184_v10 = vld [vmem:[%s344_s2] ss:$0 sm:$0xff]  ;;  %p278_p10 = scmp.ne.s32.totalorder %s175_s25, %s277_s26  ;;  %p283_p12 = scmp.lt.s32.totalorder %s277_s26, %s277_s26 }
  0x20   :  { %205 = vmatpush3.bf16.msra.mxu0 %v230_v2  ;;  %p284_p13 = por %p283_p12, %p282_p11 }
  0x21   :  { %206 = vmatprep.subr.bf16.mxu0 %v307_v0 }
  0x22   :  { %p285_p0 = pnand %p284_p13, %p278_p10 }
  0x24   :  { %207 = vmatpush3.bf16.msra.mxu0 %v231_v3 }
  0x25   :  { %208 = vmatprep.subr.bf16.mxu0 %v307_v0 }
  0x28   :  { %209 = vmatpush3.bf16.msra.mxu0 %v232_v4 }
  0x29   :  { %210 = vmatprep.subr.bf16.mxu0 %v307_v0 }
  0x2c   :  { %211 = vmatpush3.bf16.msra.mxu0 %v233_v5 }
  0x2d   :  { %212 = vmatprep.subr.bf16.mxu0 %v307_v0 }
  0x30   :  { %213 = vmatpush3.bf16.msra.mxu0 %v234_v6 }
  0x31   :  { %214 = vmatprep.subr.bf16.mxu0 %v307_v0 }
  0x34   :  { %215 = vmatpush3.bf16.msra.mxu0 %v235_v7 }
  0x35   :  { %216 = vmatprep.subr.bf16.mxu0 %v307_v0 }
  0x38   :  { %217 = vmatpush3.bf16.msra.mxu0 %v236_v8 }
  0x3b   :  { %219 = vmatmul.mubr.bf16.vlgmr.msra.gmra.mxu0 %v55_v9 }
  0xfb   :  { %v154_v11 = vpop.f32.mrf.mxu0 }
  0xfc   :  { %v160_v12 = vadd.f32 %v184_v10, %v154_v11 }
  0xfd   :  { %v220_v13 = vpop.f32.mrf.mxu0 }
  0xfe   :  { %v166_v14 = vmul.f32 0.25, %v160_v12 }
  0xff   :  { %v157_v15 = vpop.f32.mrf.mxu0 }
 0x100   :  { %167 = vst [vmem:[#allocation8] sm:$0xff] %v166_v14 }
 0x101   :  { %v221_v16 = vpop.f32.mrf.mxu0 }
 0x102   :  { %288 = shalt.err (!%p285_p0)
}
 0x103   :  { %177 = dma.vmem_to_hbm [thread:$0]  %s175_s25, 128, %s345_s3, [#allocation5]  }
 0x104   :  { %301 = dma.done.wait [#allocation5], 128  }
 0x105   :  { %302 = vsyncadd [#allocation5], 4294967168 }
 0x106   :  { %181 = vsyncpa [#allocation4], 1 }
 0x107   :  { %182 = vsyncpa [#allocation7], 1 }
 0x108   :  { %183 = vsyncpa [#allocation5], 1 }

</bundles_post_ra>
